<compile_context>
chip_gen: v7x
topology: tpu7x:2x2x1
jax: 0.10.0
libtpu: 0.0.40
codegen_flags: <defaults>
</compile_context>

<pallas_src>
import jax
import jax.numpy as jnp
from jax.experimental import pallas as pl
from jax.experimental.pallas import tpu as pltpu


def _round_up(a: int, m: int) -> int:
    return ((a + m - 1) // m) * m


def _pick_group_size(K: int, I: int, O: int) -> int:
    """Ensemble members per lane group.

    g divides K, g*O targets >= 128 output lanes, and g*I must be a multiple of
    128 unless the group spans the whole ensemble (keeps the x batch-tile
    BlockSpec (8, 128)-legal).
    """
    g_target = min(K, max(1, 128 // max(O, 1)))
    for g in range(1, K + 1):
        if K % g != 0 or g < g_target:
            continue
        if (g * I) % 128 == 0 or g == K:
            return g
    # TODO(synk): for shapes with no lane-aligned divisor < K (e.g. O >= 128
    # with I not a multiple of 128) this falls back to the full block-diagonal
    # (g = K), which wastes MXU FLOPs for large K.
    return K


def _vmem_capacity_and_budget() -> tuple[int, int]:
    cap = 64 << 20  # conservative default (v7x per-TC VMEM)
    try:
        cap = int(pltpu.get_tpu_info().vmem_capacity_bytes)
    except Exception:
        pass
    frac = 0.50 if cap <= (64 << 20) else 0.75  # v7x vs v5e/v6e
    return cap, int(cap * frac)


def _pick_batch_tile(B, GI, GOp, x_item, w_item, out_item, w_bufs, budget):
    sub = max(8, 32 // max(x_item, 1))  # dtype-aware sublane multiple

    def est(tb):
        return (2 * tb * GI * x_item            # double-buffered x tile
                + 2 * tb * GOp * out_item       # double-buffered out tile
                + w_bufs * GI * GOp * w_item    # resident grouped weight
                + w_bufs * GOp * w_item         # resident bias
                + 2 * tb * GOp * 4)             # f32 accumulator + bias broadcast

    if B <= sub:
        tb = B
    else:
        # Prefer large tiles (HBM roofline) but keep >= 2 (ideally >= 8) batch
        # grid steps for megacore sharding and DMA/compute overlap.
        tb = min(2048,
                 max(512, _round_up(pl.cdiv(B, 8), sub)),
                 (B // sub) * sub)
        while tb > sub and est(tb) > budget:
            tb = max(sub, ((tb // 2) // sub) * sub)
    # TODO(synk): if the per-group resident weight alone exceeds the budget
    # (huge g*I x g*O), a reduction grid axis over g*I would be needed.
    return tb, est(tb)


def _make_kernel(compute_dtype):
    def kernel(x_ref, w_ref, b_ref, o_ref):
        # x_ref: (tb, GI), w_ref: (1, GI, GOp), b_ref: (1, 1, GOp),
        # o_ref: (tb, GOp)   -- GOp is a multiple of 128 => lane-dense stores.
        x = x_ref[...]
        w = w_ref[0]
        if compute_dtype is not None:   # optional bf16 MXU path (v5e)
            x = x.astype(compute_dtype)
            w = w.astype(compute_dtype)
        acc = jnp.dot(x, w, preferred_element_type=jnp.float32)
        o_ref[...] = (acc + b_ref[0].astype(jnp.float32)).astype(o_ref.dtype)
    return kernel


def _grouped_block_diag(weight, G, g, GOp):
    """(K, I, O) -> (G, g*I, GOp) per-group block-diagonal, built by scatter."""
    K, I, O = weight.shape
    w_g = weight.reshape(G, g, I, O)
    idx = jnp.arange(g)
    w_bd = jnp.zeros((G, g, I, g, O), dtype=weight.dtype)
    # Advanced indices (axes 1 and 3) broadcast to the front -> value (g,G,I,O).
    w_bd = w_bd.at[:, idx, :, idx, :].set(jnp.moveaxis(w_g, 1, 0))
    w_bd = w_bd.reshape(G, g * I, g * O)
    if GOp != g * O:
        w_bd = jnp.pad(w_bd, ((0, 0), (0, 0), (0, GOp - g * O)))
    return w_bd


def ensemble_linear(x, weight, bias, *, compute_dtype=None):
    """x: (..., K, I) -> (..., K, O).  weight: (K, I, O), bias: (K, O).

    compute_dtype: optional dtype (e.g. jnp.bfloat16) for the MXU operands on
    MXU-bound parts (v5e); accumulation stays float32.
    """
    K, I, O = weight.shape
    assert x.shape[-2:] == (K, I), f"expected (..., {K}, {I}), got {x.shape}"
    assert bias.shape == (K, O)
    batch_shape = x.shape[:-2]

    g = _pick_group_size(K, I, O)
    G = K // g
    GI, GO = g * I, g * O
    GOp = _round_up(GO, 128)             # lane-dense output width

    # Free reshape: last two axes of x are contiguous, and each lane group is a
    # contiguous column range of the flattened (K*I) axis.
    x2d = x.reshape((-1, K * I))
    B = x2d.shape[0]

    w_bd = _grouped_block_diag(weight, G, g, GOp)          # (G, GI, GOp)
    b_g = bias.reshape(G, GO)
    if GOp != GO:
        b_g = jnp.pad(b_g, ((0, 0), (0, GOp - GO)))
    b_g = b_g.reshape(G, 1, GOp)

    out_dtype = jnp.result_type(x.dtype, weight.dtype)
    x_item = jnp.dtype(x.dtype).itemsize
    w_item = jnp.dtype(weight.dtype).itemsize
    out_item = jnp.dtype(out_dtype).itemsize

    cap, budget = _vmem_capacity_and_budget()
    tb, vmem_est = _pick_batch_tile(B, GI, GOp, x_item, w_item, out_item,
                                    w_bufs=1, budget=budget)
    vmem_limit = int(min(int(cap * 0.95), max(vmem_est + (6 << 20), 32 << 20)))

    # FLOPs the kernel actually issues (grouped block-diagonal incl. padding).
    cost = pl.CostEstimate(
        flops=2 * B * G * GI * GOp,
        transcendentals=0,
        bytes_accessed=(x2d.size * x_item + w_bd.size * w_item
                        + b_g.size * w_item + B * G * GOp * out_item),
    )

    def _run(single_buffer_invariants):
        if single_buffer_invariants:
            # Weight/bias blocks only change with the (outer) group axis: a
            # single buffer suffices and halves their resident VMEM.
            w_spec = pl.BlockSpec((1, GI, GOp), lambda j, b: (j, 0, 0),
                                  pipeline_mode=pl.Buffered(1))
            b_spec = pl.BlockSpec((1, 1, GOp), lambda j, b: (j, 0, 0),
                                  pipeline_mode=pl.Buffered(1))
        else:
            w_spec = pl.BlockSpec((1, GI, GOp), lambda j, b: (j, 0, 0))
            b_spec = pl.BlockSpec((1, 1, GOp), lambda j, b: (j, 0, 0))

        return pl.pallas_call(
            _make_kernel(compute_dtype),
            out_shape=jax.ShapeDtypeStruct((B, G * GOp), out_dtype),
            grid_spec=pltpu.PrefetchScalarGridSpec(
                num_scalar_prefetch=0,
                grid=(G, pl.cdiv(B, tb)),
                in_specs=[
                    pl.BlockSpec((tb, GI), lambda j, b: (b, j)),  # x batch tile
                    w_spec,
                    b_spec,
                ],
                out_specs=pl.BlockSpec((tb, GOp), lambda j, b: (b, j)),
            ),
            compiler_params=pltpu.CompilerParams(
                dimension_semantics=("arbitrary", "parallel"),
                vmem_limit_bytes=vmem_limit,
            ),
            cost_estimate=cost,
        )(x2d, w_bd, b_g)

    try:
        out2d = jax.block_until_ready(_run(True))
    except Exception:
        # pipeline_mode / pl.Buffered(1) unsupported on this build: fall back
        # to default double-buffering for the group-invariant operands.
        out2d = _run(False)

    out3 = out2d.reshape((B, G, GOp))
    if GOp != GO:
        out3 = out3[:, :, :GO]           # drop lane padding
    return out3.reshape(batch_shape + (K, O))


def init_ensemble_linear_params(key, input_dim, output_dim, ensemble_dim,
                                dtype=jnp.float32):
    """Matches EnsembleLinear.__init__: trunc_normal(std=1/(2*sqrt(I))) weight,
    zero bias."""
    # TODO(synk): torch trunc_normal_ truncates at absolute +/-2 (not +/-2*std);
    # negligible for these std values and init-only.
    std = 1.0 / (2.0 * (input_dim ** 0.5))
    w = jax.random.truncated_normal(
        key, -2.0, 2.0, (ensemble_dim, input_dim, output_dim), dtype) * std
    b = jnp.zeros((ensemble_dim, output_dim), dtype)
    return w, b


if __name__ == "__main__":
    key = jax.random.PRNGKey(0)
    k_w, k_x = jax.random.split(key)

    input_dim, output_dim, ensemble_dim = 32, 16, 4
    weight, bias = init_ensemble_linear_params(
        k_w, input_dim, output_dim, ensemble_dim)
    # non-zero bias so the bias-add path is actually exercised
    bias = bias + 0.1 * jnp.arange(output_dim, dtype=bias.dtype)[None, :]

    # x: (..., K, I) with a leading batch of 8
    x = jax.random.normal(k_x, (8, ensemble_dim, input_dim), jnp.float32)

    out = ensemble_linear(x, weight, bias)
    out = jax.block_until_ready(out)

    # Reference check against plain-JAX einsum (same semantics as torch).
    ref = jnp.einsum('kio,...ki->...ko', weight, x) + bias
    assert out.shape == (8, ensemble_dim, output_dim)
    assert jnp.allclose(out, ref, atol=1e-5, rtol=1e-5), "mismatch vs reference"

    print("KERNEL_OK")
</pallas_src>

<mosaic_0001>
module attributes {stable_mosaic.version = 11 : i64} {
  func.func @kernel(%arg0: i32, %arg1: i32, %arg2: memref<8x128xf32, #tpu.memory_space<vmem>>, %arg3: memref<1x128x128xf32, #tpu.memory_space<vmem>>, %arg4: memref<1x1x128xf32, #tpu.memory_space<vmem>>, %arg5: memref<8x128xf32, #tpu.memory_space<vmem>>) attributes {dimension_semantics = [#tpu.dimension_semantics<arbitrary>, #tpu.dimension_semantics<parallel>], iteration_bounds = array<i64: 1, 1>, scalar_prefetch = 0 : i64, scratch_operands = 0 : i64, tpu.core_type = #tpu.core_type<tc>, window_params = [{transform_indices = @transform_0, window_bounds = array<i64: 8, 128>}, {pipeline_mode = #tpu.pipeline_mode<synchronous>, transform_indices = @transform_1, window_bounds = array<i64: 1, 128, 128>}, {pipeline_mode = #tpu.pipeline_mode<synchronous>, transform_indices = @transform_2, window_bounds = array<i64: 1, 1, 128>}, {transform_indices = @transform_3, window_bounds = array<i64: 8, 128>}]} {
    %c0 = arith.constant 0 : index
    %c0_0 = arith.constant 0 : index
    %0 = vector.load %arg2[%c0, %c0_0] : memref<8x128xf32, #tpu.memory_space<vmem>>, vector<8x128xf32>
    %c0_1 = arith.constant 0 : index
    %c0_2 = arith.constant 0 : index
    %c0_3 = arith.constant 0 : index
    %1 = vector.load %arg3[%c0_1, %c0_2, %c0_3] : memref<1x128x128xf32, #tpu.memory_space<vmem>>, vector<1x128x128xf32>
    %2 = vector.shape_cast %1 : vector<1x128x128xf32> to vector<128x128xf32>
    %cst = arith.constant dense<0.000000e+00> : vector<8x128xf32>
    %3 = tpu.matmul %0, %2, %cst {dimension_numbers = #tpu.dot_dimension_numbers<[1], [0], [0], [1], [0, 0, 1, 1], [], []>} : vector<8x128xf32>, vector<128x128xf32>, vector<8x128xf32> -> vector<8x128xf32>
    %c0_4 = arith.constant 0 : index
    %c0_5 = arith.constant 0 : index
    %c0_6 = arith.constant 0 : index
    %4 = vector.load %arg4[%c0_4, %c0_5, %c0_6] : memref<1x1x128xf32, #tpu.memory_space<vmem>>, vector<1x1x128xf32>
    %5 = vector.shape_cast %4 : vector<1x1x128xf32> to vector<1x128xf32>
    %6 = vector.broadcast %5 : vector<1x128xf32> to vector<8x128xf32>
    %7 = arith.addf %3, %6 : vector<8x128xf32>
    %c0_7 = arith.constant 0 : index
    %c0_8 = arith.constant 0 : index
    %8 = vector.load %arg5[%c0_7, %c0_8] : memref<8x128xf32, #tpu.memory_space<vmem>>, vector<8x128xf32>
    tpu.vector_store %arg5[%c0_7, %c0_8], %7 {strides = array<i32>} : memref<8x128xf32, #tpu.memory_space<vmem>>, vector<8x128xf32>,
    return
  }
  func.func @transform_0(%arg0: i32, %arg1: i32) -> (i32, i32) {
    %c0_i32 = arith.constant 0 : i32
    return %arg1, %arg0 : i32, i32
  }
  func.func @transform_1(%arg0: i32, %arg1: i32) -> (i32, i32, i32) {
    %c0_i32 = arith.constant 0 : i32
    %c0_i32_0 = arith.constant 0 : i32
    %c0_i32_1 = arith.constant 0 : i32
    return %arg0, %c0_i32, %c0_i32_0 : i32, i32, i32
  }
  func.func @transform_2(%arg0: i32, %arg1: i32) -> (i32, i32, i32) {
    %c0_i32 = arith.constant 0 : i32
    %c0_i32_0 = arith.constant 0 : i32
    %c0_i32_1 = arith.constant 0 : i32
    return %arg0, %c0_i32, %c0_i32_0 : i32, i32, i32
  }
  func.func @transform_3(%arg0: i32, %arg1: i32) -> (i32, i32) {
    %c0_i32 = arith.constant 0 : i32
    return %arg1, %arg0 : i32, i32
  }
}

module attributes {stable_mosaic.version = 11 : i64} {
  func.func @kernel(%arg0: i32, %arg1: i32, %arg2: memref<8x128xf32, #tpu.memory_space<vmem>>, %arg3: memref<1x128x128xf32, #tpu.memory_space<vmem>>, %arg4: memref<1x1x128xf32, #tpu.memory_space<vmem>>, %arg5: memref<8x128xf32, #tpu.memory_space<vmem>>) attributes {dimension_semantics = [#tpu.dimension_semantics<arbitrary>, #tpu.dimension_semantics<parallel>], iteration_bounds = array<i64: 1, 1>, scalar_prefetch = 0 : i64, scratch_operands = 0 : i64, tpu.core_type = #tpu.core_type<tc>, window_params = [{transform_indices = @transform_0, window_bounds = array<i64: 8, 128>}, {transform_indices = @transform_1, window_bounds = array<i64: 1, 128, 128>}, {transform_indices = @transform_2, window_bounds = array<i64: 1, 1, 128>}, {transform_indices = @transform_3, window_bounds = array<i64: 8, 128>}]} {
    %c0 = arith.constant 0 : index
    %c0_0 = arith.constant 0 : index
    %0 = vector.load %arg2[%c0, %c0_0] : memref<8x128xf32, #tpu.memory_space<vmem>>, vector<8x128xf32>
    %c0_1 = arith.constant 0 : index
    %c0_2 = arith.constant 0 : index
    %c0_3 = arith.constant 0 : index
    %1 = vector.load %arg3[%c0_1, %c0_2, %c0_3] : memref<1x128x128xf32, #tpu.memory_space<vmem>>, vector<1x128x128xf32>
    %2 = vector.shape_cast %1 : vector<1x128x128xf32> to vector<128x128xf32>
    %cst = arith.constant dense<0.000000e+00> : vector<8x128xf32>
    %3 = tpu.matmul %0, %2, %cst {dimension_numbers = #tpu.dot_dimension_numbers<[1], [0], [0], [1], [0, 0, 1, 1], [], []>} : vector<8x128xf32>, vector<128x128xf32>, vector<8x128xf32> -> vector<8x128xf32>
    %c0_4 = arith.constant 0 : index
    %c0_5 = arith.constant 0 : index
    %c0_6 = arith.constant 0 : index
    %4 = vector.load %arg4[%c0_4, %c0_5, %c0_6] : memref<1x1x128xf32, #tpu.memory_space<vmem>>, vector<1x1x128xf32>
    %5 = vector.shape_cast %4 : vector<1x1x128xf32> to vector<1x128xf32>
    %6 = vector.broadcast %5 : vector<1x128xf32> to vector<8x128xf32>
    %7 = arith.addf %3, %6 : vector<8x128xf32>
    %c0_7 = arith.constant 0 : index
    %c0_8 = arith.constant 0 : index
    %8 = vector.load %arg5[%c0_7, %c0_8] : memref<8x128xf32, #tpu.memory_space<vmem>>, vector<8x128xf32>
    tpu.vector_store %arg5[%c0_7, %c0_8], %7 {strides = array<i32>} : memref<8x128xf32, #tpu.memory_space<vmem>>, vector<8x128xf32>,
    return
  }
  func.func @transform_0(%arg0: i32, %arg1: i32) -> (i32, i32) {
    %c0_i32 = arith.constant 0 : i32
    return %arg1, %arg0 : i32, i32
  }
  func.func @transform_1(%arg0: i32, %arg1: i32) -> (i32, i32, i32) {
    %c0_i32 = arith.constant 0 : i32
    %c0_i32_0 = arith.constant 0 : i32
    %c0_i32_1 = arith.constant 0 : i32
    return %arg0, %c0_i32, %c0_i32_0 : i32, i32, i32
  }
  func.func @transform_2(%arg0: i32, %arg1: i32) -> (i32, i32, i32) {
    %c0_i32 = arith.constant 0 : i32
    %c0_i32_0 = arith.constant 0 : i32
    %c0_i32_1 = arith.constant 0 : i32
    return %arg0, %c0_i32, %c0_i32_0 : i32, i32, i32
  }
  func.func @transform_3(%arg0: i32, %arg1: i32) -> (i32, i32) {
    %c0_i32 = arith.constant 0 : i32
    return %arg1, %arg0 : i32, i32
  }
}

</mosaic_0001>

<bundles_post_ra>
// kernel: tpu_custom_call.1
= control target key start
LH: loop header
LB: loop body
LE: loop exit
PB: predicated region body
PF: predicated region fallthrough
CT: control target
= control target key end

     0   :  { %8 = vsyncpa [#allocation3], 0  ;;  %s383_s0 = inlined_call_operand.hbm [shape: f32[8,128], index: 0, kind: input, shape index: {}]   ;;  %s384_s1 = inlined_call_operand.hbm [shape: f32[1,128,128], index: 1, kind: input, shape index: {}]   ;;  %s385_s2 = inlined_call_operand.vmem [shape: f32[1,1,128], index: 2, kind: input, shape index: {}]   ;;  %s386_s3 = inlined_call_operand.hbm [shape: f32[8,128], index: 3, kind: output, shape index: {}]  }
   0x1   :  { %9 = vsyncpa [#allocation6], 0 }
   0x2   :  { %10 = vsyncpa [#allocation4], 0  ;;  %s309_s12 = smov [#allocation2]   ;;  %s310_s14 = smov [#allocation5]  }
   0x3   :  { %s17_s13 = sshll.u32 %s309_s12, 4  ;;  %s26_s15 = sshll.u32 %s310_s14, 4  ;;  %s18_s13 = int_to_ptr.vmem [resolvable:$true] %s17_s13  ;;  %s337_s15 = int_to_ptr.vmem [resolvable:$true] %s26_s15 }
   0x4   :  { %s237_s18 = scalar_lea.hbm %s383_s0, 128 }
   0x5   :  { %p238_p0 = scmp.ne.s32.totalorder %s383_s0, %s237_s18  ;;  %p241_p1 = scmp.lt.u32.totalorder %s237_s18, %s383_s0 }
   0x7   :  { %p243_p2 = pnand %p241_p1, %p238_p0 }
   0x9   :  { %246 = shalt.err (!%p243_p2)
}
   0xa   :  { %s247_s23 = scalar_lea.vmem %s18_s13, 128  ;;  %p252_p4 = scmp.lt.s32.totalorder %s18_s13, %s18_s13 }
   0xb   :  { %p248_p3 = scmp.ne.s32.totalorder %s18_s13, %s247_s23  ;;  %p253_p5 = scmp.lt.s32.totalorder %s247_s23, %s247_s23 }
   0xd   :  { %p254_p6 = por %p253_p5, %p252_p4 }
   0xf   :  { %p255_p7 = pnand %p254_p6, %p248_p3 }
  0x11   :  { %258 = shalt.err (!%p255_p7)
}
  0x12   :  { %20 = dma.hbm_to_vmem [thread:$0]  %s383_s0, 128, %s18_s13, [#allocation3]  }
  0x13   :  { %s259_s28 = scalar_lea.hbm %s384_s1, 2048 }
  0x14   :  { %p260_p8 = scmp.ne.s32.totalorder %s384_s1, %s259_s28  ;;  %p263_p9 = scmp.lt.u32.totalorder %s259_s28, %s384_s1 }
  0x16   :  { %p265_p10 = pnand %p263_p9, %p260_p8 }
  0x18   :  { %268 = shalt.err (!%p265_p10)
}
  0x19   :  { %s269_s6 = scalar_lea.vmem %s337_s15, 2048  ;;  %p274_p12 = scmp.lt.s32.totalorder %s337_s15, %s337_s15 }
  0x1a   :  { %p270_p11 = scmp.ne.s32.totalorder %s337_s15, %s269_s6  ;;  %p275_p13 = scmp.lt.s32.totalorder %s269_s6, %s269_s6 }
  0x1c   :  { %p276_p0 = por %p275_p13, %p274_p12 }
  0x1e   :  { %p277_p1 = pnand %p276_p0, %p270_p11 }
  0x20   :  { %280 = shalt.err (!%p277_p1)
}
  0x21   :  { %s311_s0 = smov 128   ;;  %s312_s7 = smov 8  }
  0x22   :  { %32 = dma.hbm_to_vmem [thread:$0]  %s384_s1, 2048, %s337_s15, [#allocation6], %s311_s0, %s311_s0, %s312_s7  }
  0x23   :  { %303 = dma.done.wait [#allocation3], 128  }
  0x24   :  { %304 = vsyncadd [#allocation3], 4294967168 }
  0x25   :  { %305 = dma.done.wait [#allocation6], 2048  }
  0x26   :  { %306 = vsyncadd [#allocation6], 4294965248  ;;  %v313_v0 = vmov 0.0|0.0   ;;  %vm314_vm0 = vmmov 0   ;;  %v315_v1 = vmov 0.0   ;;  %v42_v2 = vld [vmem:[#allocation5] sm:$0xff] }
  0x27   :  { %205 = vmatprep.subr.bf16.mxu0 %v313_v0  ;;  %202 = vmatprep.mubr.msk.f32.mxu0 %vm314_vm0, %v315_v1  ;;  %v43_v3 = vld [vmem:[#allocation5 + $0x8] sm:$0xff]  ;;  %v44_v4 = vld [vmem:[#allocation5 + $0x10] sm:$0xff]  ;;  %v45_v6 = vld [vmem:[#allocation5 + $0x18] sm:$0xff]  ;;  %s316_s11 = smov [#allocation7]  }
  0x28   :  { %v206_v5 = vpack.c.bf16 %v43_v3, %v42_v2  ;;  %v209_v7 = vpack.c.bf16 %v45_v6, %v44_v4  ;;  %v46_v8 = vld [vmem:[#allocation5 + $0x20] sm:$0xff]  ;;  %v47_v9 = vld [vmem:[#allocation5 + $0x28] sm:$0xff]  ;;  %v48_v11 = vld [vmem:[#allocation5 + $0x30] sm:$0xff]  ;;  %s142_s12 = sshll.u32 %s316_s11, 4  ;;  %s143_s12 = int_to_ptr.vmem [resolvable:$true] %s142_s12 }
  0x29   :  { %v212_v10 = vpack.c.bf16 %v47_v9, %v46_v8  ;;  %v49_v12 = vld [vmem:[#allocation5 + $0x38] sm:$0xff]  ;;  %v50_v14 = vld [vmem:[#allocation5 + $0x40] sm:$0xff]  ;;  %v51_v15 = vld [vmem:[#allocation5 + $0x48] sm:$0xff]  ;;  %s281_s13 = scalar_lea.vmem %s143_s12, 128  ;;  %p286_p3 = scmp.lt.s32.totalorder %s143_s12, %s143_s12 }
  0x2a   :  { %207 = vmatpush3.bf16.msra.mxu0 %v206_v5  ;;  %v215_v13 = vpack.c.bf16 %v49_v12, %v48_v11  ;;  %v218_v16 = vpack.c.bf16 %v51_v15, %v50_v14  ;;  %v52_v17 = vld [vmem:[#allocation5 + $0x50] sm:$0xff]  ;;  %v53_v18 = vld [vmem:[#allocation5 + $0x58] sm:$0xff]  ;;  %v54_v20 = vld [vmem:[#allocation5 + $0x60] sm:$0xff]  ;;  %p282_p2 = scmp.ne.s32.totalorder %s143_s12, %s281_s13  ;;  %p287_p4 = scmp.lt.s32.totalorder %s281_s13, %s281_s13 }
  0x2b   :  { %208 = vmatprep.subr.bf16.mxu0 %v313_v0  ;;  %v221_v19 = vpack.c.bf16 %v53_v18, %v52_v17  ;;  %v55_v21 = vld [vmem:[#allocation5 + $0x68] sm:$0xff]  ;;  %v56_v23 = vld [vmem:[#allocation5 + $0x70] sm:$0xff]  ;;  %v57_v24 = vld [vmem:[#allocation5 + $0x78] sm:$0xff] }
  0x2c   :  { %v224_v22 = vpack.c.bf16 %v55_v21, %v54_v20  ;;  %v227_v25 = vpack.c.bf16 %v57_v24, %v56_v23  ;;  %v41_v26 = vld [vmem:[#allocation2] sm:$0xff]  ;;  %p288_p5 = por %p287_p4, %p286_p3 }
  0x2d   :  { %v152_v27 = vld [vmem:[%s385_s2] ss:$0 sm:$0xff] }
  0x2e   :  { %210 = vmatpush3.bf16.msra.mxu0 %v209_v7  ;;  %p289_p6 = pnand %p288_p5, %p282_p2 }
  0x2f   :  { %211 = vmatprep.subr.bf16.mxu0 %v313_v0 }
  0x32   :  { %213 = vmatpush3.bf16.msra.mxu0 %v212_v10 }
  0x33   :  { %214 = vmatprep.subr.bf16.mxu0 %v313_v0 }
  0x36   :  { %216 = vmatpush3.bf16.msra.mxu0 %v215_v13 }
  0x37   :  { %217 = vmatprep.subr.bf16.mxu0 %v313_v0 }
  0x3a   :  { %219 = vmatpush3.bf16.msra.mxu0 %v218_v16 }
  0x3b   :  { %220 = vmatprep.subr.bf16.mxu0 %v313_v0 }
  0x3e   :  { %222 = vmatpush3.bf16.msra.mxu0 %v221_v19 }
  0x3f   :  { %223 = vmatprep.subr.bf16.mxu0 %v313_v0 }
  0x42   :  { %225 = vmatpush3.bf16.msra.mxu0 %v224_v22 }
  0x43   :  { %226 = vmatprep.subr.bf16.mxu0 %v313_v0 }
  0x46   :  { %228 = vmatpush3.bf16.msra.mxu0 %v227_v25 }
  0x49   :  { %203 = vmatmul.mubr.f32.vlgmr.msra.gmra.mrb[0].mxu0 %v41_v26 }
 0x11c   :  { %v131_v28 = vpop.f32.mrb[0].mxu0 }
 0x11d   :  { %v132_v29 = vadd.f32 %v152_v27, %v131_v28  ;;  %v204_v30 = vpop.f32.mrb[1].mxu0 }
 0x11f   :  { %135 = vst [vmem:[#allocation7] sm:$0xff] %v132_v29 }
 0x120   :  { %292 = shalt.err (!%p289_p6)
}
 0x121   :  { %s293_s16 = scalar_lea.hbm %s386_s3, 128 }
 0x122   :  { %p294_p7 = scmp.ne.s32.totalorder %s386_s3, %s293_s16  ;;  %p297_p8 = scmp.lt.u32.totalorder %s293_s16, %s386_s3 }
 0x124   :  { %p299_p9 = pnand %p297_p8, %p294_p7 }
 0x126   :  { %302 = shalt.err (!%p299_p9)
}
 0x127   :  { %145 = dma.vmem_to_hbm [thread:$0]  %s143_s12, 128, %s386_s3, [#allocation4]  }
 0x128   :  { %307 = dma.done.wait [#allocation4], 128  }
 0x129   :  { %308 = vsyncadd [#allocation4], 4294967168 }
 0x12a   :  { %149 = vsyncpa [#allocation3], 1 }
 0x12b   :  { %150 = vsyncpa [#allocation6], 1 }
 0x12c   :  { %151 = vsyncpa [#allocation4], 1 }

// kernel: tpu_custom_call.1
= control target key start
LH: loop header
LB: loop body
LE: loop exit
PB: predicated region body
PF: predicated region fallthrough
CT: control target
= control target key end

     0   :  { %8 = vsyncpa [#allocation3], 0  ;;  %s383_s0 = inlined_call_operand.hbm [shape: f32[8,128], index: 0, kind: input, shape index: {}]   ;;  %s384_s1 = inlined_call_operand.hbm [shape: f32[1,128,128], index: 1, kind: input, shape index: {}]   ;;  %s385_s2 = inlined_call_operand.vmem [shape: f32[1,1,128], index: 2, kind: input, shape index: {}]   ;;  %s386_s3 = inlined_call_operand.hbm [shape: f32[8,128], index: 3, kind: output, shape index: {}]  }
   0x1   :  { %9 = vsyncpa [#allocation6], 0 }
   0x2   :  { %10 = vsyncpa [#allocation4], 0  ;;  %s309_s12 = smov [#allocation2]   ;;  %s310_s14 = smov [#allocation5]  }
   0x3   :  { %s17_s13 = sshll.u32 %s309_s12, 4  ;;  %s26_s15 = sshll.u32 %s310_s14, 4  ;;  %s18_s13 = int_to_ptr.vmem [resolvable:$true] %s17_s13  ;;  %s337_s15 = int_to_ptr.vmem [resolvable:$true] %s26_s15 }
   0x4   :  { %s237_s18 = scalar_lea.hbm %s383_s0, 128 }
   0x5   :  { %p238_p0 = scmp.ne.s32.totalorder %s383_s0, %s237_s18  ;;  %p241_p1 = scmp.lt.u32.totalorder %s237_s18, %s383_s0 }
   0x7   :  { %p243_p2 = pnand %p241_p1, %p238_p0 }
   0x9   :  { %246 = shalt.err (!%p243_p2)
}
   0xa   :  { %s247_s23 = scalar_lea.vmem %s18_s13, 128  ;;  %p252_p4 = scmp.lt.s32.totalorder %s18_s13, %s18_s13 }
   0xb   :  { %p248_p3 = scmp.ne.s32.totalorder %s18_s13, %s247_s23  ;;  %p253_p5 = scmp.lt.s32.totalorder %s247_s23, %s247_s23 }
   0xd   :  { %p254_p6 = por %p253_p5, %p252_p4 }
   0xf   :  { %p255_p7 = pnand %p254_p6, %p248_p3 }
  0x11   :  { %258 = shalt.err (!%p255_p7)
}
  0x12   :  { %20 = dma.hbm_to_vmem [thread:$0]  %s383_s0, 128, %s18_s13, [#allocation3]  }
  0x13   :  { %s259_s28 = scalar_lea.hbm %s384_s1, 2048 }
  0x14   :  { %p260_p8 = scmp.ne.s32.totalorder %s384_s1, %s259_s28  ;;  %p263_p9 = scmp.lt.u32.totalorder %s259_s28, %s384_s1 }
  0x16   :  { %p265_p10 = pnand %p263_p9, %p260_p8 }
  0x18   :  { %268 = shalt.err (!%p265_p10)
}
  0x19   :  { %s269_s6 = scalar_lea.vmem %s337_s15, 2048  ;;  %p274_p12 = scmp.lt.s32.totalorder %s337_s15, %s337_s15 }
  0x1a   :  { %p270_p11 = scmp.ne.s32.totalorder %s337_s15, %s269_s6  ;;  %p275_p13 = scmp.lt.s32.totalorder %s269_s6, %s269_s6 }
  0x1c   :  { %p276_p0 = por %p275_p13, %p274_p12 }
  0x1e   :  { %p277_p1 = pnand %p276_p0, %p270_p11 }
  0x20   :  { %280 = shalt.err (!%p277_p1)
}
  0x21   :  { %s311_s0 = smov 128   ;;  %s312_s7 = smov 8  }
  0x22   :  { %32 = dma.hbm_to_vmem [thread:$0]  %s384_s1, 2048, %s337_s15, [#allocation6], %s311_s0, %s311_s0, %s312_s7  }
  0x23   :  { %303 = dma.done.wait [#allocation3], 128  }
  0x24   :  { %304 = vsyncadd [#allocation3], 4294967168 }
  0x25   :  { %305 = dma.done.wait [#allocation6], 2048  }
  0x26   :  { %306 = vsyncadd [#allocation6], 4294965248  ;;  %v313_v0 = vmov 0.0|0.0   ;;  %vm314_vm0 = vmmov 0   ;;  %v315_v1 = vmov 0.0   ;;  %v42_v2 = vld [vmem:[#allocation5] sm:$0xff] }
  0x27   :  { %205 = vmatprep.subr.bf16.mxu0 %v313_v0  ;;  %202 = vmatprep.mubr.msk.f32.mxu0 %vm314_vm0, %v315_v1  ;;  %v43_v3 = vld [vmem:[#allocation5 + $0x8] sm:$0xff]  ;;  %v44_v4 = vld [vmem:[#allocation5 + $0x10] sm:$0xff]  ;;  %v45_v6 = vld [vmem:[#allocation5 + $0x18] sm:$0xff]  ;;  %s316_s11 = smov [#allocation7]  }
  0x28   :  { %v206_v5 = vpack.c.bf16 %v43_v3, %v42_v2  ;;  %v209_v7 = vpack.c.bf16 %v45_v6, %v44_v4  ;;  %v46_v8 = vld [vmem:[#allocation5 + $0x20] sm:$0xff]  ;;  %v47_v9 = vld [vmem:[#allocation5 + $0x28] sm:$0xff]  ;;  %v48_v11 = vld [vmem:[#allocation5 + $0x30] sm:$0xff]  ;;  %s142_s12 = sshll.u32 %s316_s11, 4  ;;  %s143_s12 = int_to_ptr.vmem [resolvable:$true] %s142_s12 }
  0x29   :  { %v212_v10 = vpack.c.bf16 %v47_v9, %v46_v8  ;;  %v49_v12 = vld [vmem:[#allocation5 + $0x38] sm:$0xff]  ;;  %v50_v14 = vld [vmem:[#allocation5 + $0x40] sm:$0xff]  ;;  %v51_v15 = vld [vmem:[#allocation5 + $0x48] sm:$0xff]  ;;  %s281_s13 = scalar_lea.vmem %s143_s12, 128  ;;  %p286_p3 = scmp.lt.s32.totalorder %s143_s12, %s143_s12 }
  0x2a   :  { %207 = vmatpush3.bf16.msra.mxu0 %v206_v5  ;;  %v215_v13 = vpack.c.bf16 %v49_v12, %v48_v11  ;;  %v218_v16 = vpack.c.bf16 %v51_v15, %v50_v14  ;;  %v52_v17 = vld [vmem:[#allocation5 + $0x50] sm:$0xff]  ;;  %v53_v18 = vld [vmem:[#allocation5 + $0x58] sm:$0xff]  ;;  %v54_v20 = vld [vmem:[#allocation5 + $0x60] sm:$0xff]  ;;  %p282_p2 = scmp.ne.s32.totalorder %s143_s12, %s281_s13  ;;  %p287_p4 = scmp.lt.s32.totalorder %s281_s13, %s281_s13 }
  0x2b   :  { %208 = vmatprep.subr.bf16.mxu0 %v313_v0  ;;  %v221_v19 = vpack.c.bf16 %v53_v18, %v52_v17  ;;  %v55_v21 = vld [vmem:[#allocation5 + $0x68] sm:$0xff]  ;;  %v56_v23 = vld [vmem:[#allocation5 + $0x70] sm:$0xff]  ;;  %v57_v24 = vld [vmem:[#allocation5 + $0x78] sm:$0xff] }
  0x2c   :  { %v224_v22 = vpack.c.bf16 %v55_v21, %v54_v20  ;;  %v227_v25 = vpack.c.bf16 %v57_v24, %v56_v23  ;;  %v41_v26 = vld [vmem:[#allocation2] sm:$0xff]  ;;  %p288_p5 = por %p287_p4, %p286_p3 }
  0x2d   :  { %v152_v27 = vld [vmem:[%s385_s2] ss:$0 sm:$0xff] }
  0x2e   :  { %210 = vmatpush3.bf16.msra.mxu0 %v209_v7  ;;  %p289_p6 = pnand %p288_p5, %p282_p2 }
  0x2f   :  { %211 = vmatprep.subr.bf16.mxu0 %v313_v0 }
  0x32   :  { %213 = vmatpush3.bf16.msra.mxu0 %v212_v10 }
  0x33   :  { %214 = vmatprep.subr.bf16.mxu0 %v313_v0 }
  0x36   :  { %216 = vmatpush3.bf16.msra.mxu0 %v215_v13 }
  0x37   :  { %217 = vmatprep.subr.bf16.mxu0 %v313_v0 }
  0x3a   :  { %219 = vmatpush3.bf16.msra.mxu0 %v218_v16 }
  0x3b   :  { %220 = vmatprep.subr.bf16.mxu0 %v313_v0 }
  0x3e   :  { %222 = vmatpush3.bf16.msra.mxu0 %v221_v19 }
  0x3f   :  { %223 = vmatprep.subr.bf16.mxu0 %v313_v0 }
  0x42   :  { %225 = vmatpush3.bf16.msra.mxu0 %v224_v22 }
  0x43   :  { %226 = vmatprep.subr.bf16.mxu0 %v313_v0 }
  0x46   :  { %228 = vmatpush3.bf16.msra.mxu0 %v227_v25 }
  0x49   :  { %203 = vmatmul.mubr.f32.vlgmr.msra.gmra.mrb[0].mxu0 %v41_v26 }
 0x11c   :  { %v131_v28 = vpop.f32.mrb[0].mxu0 }
 0x11d   :  { %v132_v29 = vadd.f32 %v152_v27, %v131_v28  ;;  %v204_v30 = vpop.f32.mrb[1].mxu0 }
 0x11f   :  { %135 = vst [vmem:[#allocation7] sm:$0xff] %v132_v29 }
 0x120   :  { %292 = shalt.err (!%p289_p6)
}
 0x121   :  { %s293_s16 = scalar_lea.hbm %s386_s3, 128 }
 0x122   :  { %p294_p7 = scmp.ne.s32.totalorder %s386_s3, %s293_s16  ;;  %p297_p8 = scmp.lt.u32.totalorder %s293_s16, %s386_s3 }
 0x124   :  { %p299_p9 = pnand %p297_p8, %p294_p7 }
 0x126   :  { %302 = shalt.err (!%p299_p9)
}
 0x127   :  { %145 = dma.vmem_to_hbm [thread:$0]  %s143_s12, 128, %s386_s3, [#allocation4]  }
 0x128   :  { %307 = dma.done.wait [#allocation4], 128  }
 0x129   :  { %308 = vsyncadd [#allocation4], 4294967168 }
 0x12a   :  { %149 = vsyncpa [#allocation3], 1 }
 0x12b   :  { %150 = vsyncpa [#allocation6], 1 }
 0x12c   :  { %151 = vsyncpa [#allocation4], 1 }

</bundles_post_ra>
